<compile_context>
chip_gen: v7x
topology: tpu7x:2x2x1
jax: 0.10.0
libtpu: 0.0.40
codegen_flags: <defaults>
</compile_context>

<pallas_src>
import functools

import jax
import jax.numpy as jnp
from jax.experimental import pallas as pl
from jax.experimental.pallas import tpu as pltpu

_LANE = 128


def _round_up(x, m):
    return (x + m - 1) // m * m


def _hw_plan():
    """Per-generation matmul tile plan.  v6e (128 MiB VMEM) can afford
    2048x1024; v7x (64 MiB/TC) and v5e stay at 1024x512 which is already past
    the roofline knee of both."""
    kind = ""
    try:
        kind = jax.devices()[0].device_kind.lower()
    except Exception:
        pass
    if "v6" in kind:
        return dict(tm=2048, tn=1024, vmem=96 * 1024 * 1024)
    if "v5" in kind:
        return dict(tm=1024, tn=512, vmem=96 * 1024 * 1024)
    # v7x / unknown: conservative scoped-VMEM cap.
    return dict(tm=1024, tn=512, vmem=48 * 1024 * 1024)


_PLAN = _hw_plan()


def _k_plan(k):
    """(padded K, K tile).  Single full-extent K step whenever the tiles fit
    comfortably in VMEM (every ResNet50 reduction except layer4.0's stride-2
    3x3 im2col); otherwise a lane-aligned tile that divides K exactly so no
    padded-K MXU work and no padding copy of the patch matrix is needed."""
    if k <= 2304:
        return k, k
    for tk in (2048, 1792, 1536, 1280, 1152, 1024, 768, 640, 512, 384, 256, 128):
        if k % tk == 0:
            return k, tk
    kp = _round_up(k, 128)
    return kp, 128


# ----------------------------- Pallas kernels -----------------------------

def _mm_single_kernel(x_ref, w_ref, b_ref, o_ref, *, relu):
    # Single full-extent K step: no scratch accumulator, no k==0/k==last gates.
    y = jnp.dot(x_ref[...], w_ref[...], preferred_element_type=jnp.float32)
    y = y + b_ref[...]
    if relu:
        y = jnp.maximum(y, 0.0)
    o_ref[...] = y.astype(o_ref.dtype)


def _mm_single_res_kernel(x_ref, w_ref, b_ref, r_ref, o_ref, *, relu):
    y = jnp.dot(x_ref[...], w_ref[...], preferred_element_type=jnp.float32)
    y = y + b_ref[...] + r_ref[...].astype(jnp.float32)
    if relu:
        y = jnp.maximum(y, 0.0)
    o_ref[...] = y.astype(o_ref.dtype)


def _mm_multi_kernel(x_ref, w_ref, b_ref, o_ref, acc_ref, *, relu):
    k = pl.program_id(2)

    @pl.when(k == 0)
    def _():
        acc_ref[...] = jnp.broadcast_to(b_ref[...], acc_ref.shape)

    acc_ref[...] += jnp.dot(x_ref[...], w_ref[...],
                            preferred_element_type=jnp.float32)

    @pl.when(k == pl.num_programs(2) - 1)
    def _():
        y = acc_ref[...]
        if relu:
            y = jnp.maximum(y, 0.0)
        o_ref[...] = y.astype(o_ref.dtype)


def _mm_multi_res_kernel(x_ref, w_ref, b_ref, r_ref, o_ref, acc_ref, *, relu):
    k = pl.program_id(2)

    @pl.when(k == 0)
    def _():
        acc_ref[...] = jnp.broadcast_to(b_ref[...], acc_ref.shape)

    acc_ref[...] += jnp.dot(x_ref[...], w_ref[...],
                            preferred_element_type=jnp.float32)

    @pl.when(k == pl.num_programs(2) - 1)
    def _():
        y = acc_ref[...] + r_ref[...].astype(jnp.float32)
        if relu:
            y = jnp.maximum(y, 0.0)
        o_ref[...] = y.astype(o_ref.dtype)


def _conv3x3_s1_kernel(x_ref, w_ref, b_ref, o_ref, *, relu):
    """Fused direct 3x3 stride-1 conv + folded BN + ReLU.

    x_ref : (1, OH+2, Wpp, Cp)   zero-padded bf16 input, Wpp multiple of 16
    w_ref : (3, 3*Cp, tn)        bf16 weights (BN scale folded), rows (dj, c)
    b_ref : (1, tn)              f32 folded BN bias
    o_ref : (1, OH, OW, tn)      bf16 output
    The nine taps are assembled in VMEM (row slice of the resident image block
    + column shift + channel concat) -> no HBM im2col patches.
    """
    oh, ow = o_ref.shape[1], o_ref.shape[2]
    x = x_ref[0]                                  # (OH+2, Wpp, Cp)
    wpp, cp = x.shape[1], x.shape[2]
    m = oh * wpp
    acc = jnp.broadcast_to(b_ref[...], (m, b_ref.shape[1]))
    for di in range(3):
        # rows (r, w) of `flat` hold x_padded[r + di, w, :]
        flat = x[di:di + oh].reshape(m, cp)
        taps = [flat]
        for dj in (1, 2):
            shifted = jnp.concatenate(
                [flat[dj:], jnp.zeros((dj, cp), flat.dtype)], axis=0)
            taps.append(shifted)                  # -> x_padded[r + di, w + dj]
        lhs = jnp.concatenate(taps, axis=-1)      # (m, 3*Cp)
        acc = acc + jnp.dot(lhs, w_ref[di],
                            preferred_element_type=jnp.float32)
    if relu:
        acc = jnp.maximum(acc, 0.0)
    y = acc.reshape(oh, wpp, -1)[:, :ow, :]       # drop garbage pad columns
    o_ref[0] = y.astype(o_ref.dtype)


def _maxpool_kernel(ee_ref, eo_ref, oe_ref, oo_ref, o_ref):
    """MaxPool2d(3, stride=2, padding=1) from four parity-split planes of the
    -inf padded input (row-even/odd x col-even/odd)."""
    oh, ow = o_ref.shape[1], o_ref.shape[2]
    planes = ((ee_ref[0], eo_ref[0]), (oe_ref[0], oo_ref[0]))
    out = None
    for di in range(3):
        for dj in range(3):
            src = planes[di % 2][dj % 2]
            tap = src[di // 2:di // 2 + oh, dj // 2:dj // 2 + ow, :]
            out = tap if out is None else jnp.maximum(out, tap)
    o_ref[0] = out


def _avgpool_kernel(x_ref, o_ref):
    # x_ref: (1, H*W, C) -> f32 mean over the spatial axis.
    o_ref[...] = jnp.mean(x_ref[...].astype(jnp.float32), axis=1, keepdims=True)


# ----------------------------- Pallas wrappers -----------------------------

def matmul_bias_act(x2d, w, bias, *, relu, residual=None):
    """[M, K] bf16 patches @ [Kp, Np] bf16 (BN-scale-folded) weights with the
    bias-initialised f32 accumulator, optional residual add and ReLU fused."""
    M, K = x2d.shape
    Kp, Np = w.shape
    kp_expected, tk = _k_plan(K)
    assert Kp == kp_expected, (K, Kp, kp_expected)
    if Kp != K:                      # never triggers for ResNet50 K values
        x2d = jnp.pad(x2d, ((0, 0), (0, Kp - K)))
    x2d = x2d.astype(jnp.bfloat16)

    tm = M if M <= _PLAN['tm'] else _PLAN['tm']
    tn = min(_PLAN['tn'], Np)
    k_steps = Kp // tk
    grid = (pl.cdiv(M, tm), Np // tn, k_steps)

    in_specs = [
        pl.BlockSpec((tm, tk), lambda i, j, k: (i, k)),
        pl.BlockSpec((tk, tn), lambda i, j, k: (k, j)),
        pl.BlockSpec((1, tn), lambda i, j, k: (0, j)),
    ]
    args = [x2d, w, bias]
    if residual is not None:
        assert residual.shape == (M, Np)
        in_specs.append(pl.BlockSpec((tm, tn), lambda i, j, k: (i, j)))
        args.append(residual.astype(jnp.bfloat16))
        kern = _mm_multi_res_kernel if k_steps > 1 else _mm_single_res_kernel
    else:
        kern = _mm_multi_kernel if k_steps > 1 else _mm_single_kernel
    scratch = [pltpu.VMEM((tm, tn), jnp.float32)] if k_steps > 1 else []

    return pl.pallas_call(
        functools.partial(kern, relu=relu),
        out_shape=jax.ShapeDtypeStruct((M, Np), jnp.bfloat16),
        grid_spec=pltpu.PrefetchScalarGridSpec(
            num_scalar_prefetch=0,
            grid=grid,
            in_specs=in_specs,
            out_specs=pl.BlockSpec((tm, tn), lambda i, j, k: (i, j)),
            scratch_shapes=scratch,
        ),
        compiler_params=pltpu.CompilerParams(
            dimension_semantics=("parallel", "parallel", "arbitrary"),
            vmem_limit_bytes=_PLAN['vmem']),
    )(*args)


def conv3x3_s1_bn_act(x, p, *, relu):
    """Fused direct 3x3/s1 conv (+BN+ReLU): no HBM im2col patch tensor."""
    N, H, W, C = x.shape
    Np = p['np']
    assert p['w'].shape[0] == 9 * C, (p['w'].shape, C)
    wpp = _round_up(W + 2, 16)                   # sublane-friendly width
    xp = jnp.pad(x, ((0, 0), (1, 1), (1, wpp - W - 1), (0, 0)))
    w3 = p['w'].reshape(3, 3 * C, Np)            # rows ordered (dj, cin)
    tn = min(256, Np)
    return pl.pallas_call(
        functools.partial(_conv3x3_s1_kernel, relu=relu),
        out_shape=jax.ShapeDtypeStruct((N, H, W, Np), jnp.bfloat16),
        grid_spec=pltpu.PrefetchScalarGridSpec(
            num_scalar_prefetch=0,
            grid=(N, Np // tn),
            in_specs=[
                pl.BlockSpec((1, H + 2, wpp, C), lambda n, j: (n, 0, 0, 0)),
                pl.BlockSpec((3, 3 * C, tn), lambda n, j: (0, 0, j)),
                pl.BlockSpec((1, tn), lambda n, j: (0, j)),
            ],
            out_specs=pl.BlockSpec((1, H, W, tn), lambda n, j: (n, 0, 0, j)),
        ),
        compiler_params=pltpu.CompilerParams(
            dimension_semantics=("parallel", "parallel"),
            vmem_limit_bytes=_PLAN['vmem']),
    )(xp, w3, p['bias'])


def _im2col(x, kh, kw, stride, pad):
    """NHWC -> [N*OH*OW, KH*KW*C] patches.  Only used by the 7x7 stem and the
    three stride-2 3x3 convs (stride-1 3x3 convs use the fused kernel)."""
    N, H, W, C = x.shape
    OH = (H + 2 * pad - kh) // stride + 1
    OW = (W + 2 * pad - kw) // stride + 1
    if kh == 1 and kw == 1 and pad == 0:
        p = x[:, ::stride, ::stride, :][:, :OH, :OW, :]
        return p.reshape(N * OH * OW, C), (N, OH, OW)
    xp = jnp.pad(x, ((0, 0), (pad, pad), (pad, pad), (0, 0)))
    cols = [xp[:, i:i + stride * OH:stride, j:j + stride * OW:stride, :]
            for i in range(kh) for j in range(kw)]
    patches = jnp.concatenate(cols, axis=-1)     # order: kh, kw, c
    return patches.reshape(N * OH * OW, kh * kw * C), (N, OH, OW)


def conv_bn_act(x, p, *, stride, pad, relu, residual=None):
    if p['kh'] == 3 and stride == 1:
        assert residual is None and pad == 1
        return conv3x3_s1_bn_act(x, p, relu=relu)
    patches, (N, OH, OW) = _im2col(x, p['kh'], p['kw'], stride, pad)
    res2d = None
    if residual is not None:
        res2d = residual.reshape(N * OH * OW, p['np'])
    out2d = matmul_bias_act(patches, p['w'], p['bias'],
                            relu=relu, residual=res2d)
    return out2d.reshape(N, OH, OW, p['np'])


def maxpool_3x3_s2(x):
    """MaxPool2d(kernel=3, stride=2, padding=1) over parity-split planes."""
    N, H, W, C = x.shape
    assert H % 2 == 0 and W % 2 == 0, (H, W)
    OH, OW = H // 2, W // 2
    xp = jnp.pad(x, ((0, 0), (1, 1), (1, 1), (0, 0)),
                 constant_values=-jnp.inf)
    # row-even/odd x col-even/odd planes (total ~1x input traffic, not 9x).
    planes = [xp[:, i::2, j::2, :] for i in (0, 1) for j in (0, 1)]
    Hp2, Wp2 = planes[0].shape[1], planes[0].shape[2]
    return pl.pallas_call(
        _maxpool_kernel,
        out_shape=jax.ShapeDtypeStruct((N, OH, OW, C), x.dtype),
        grid_spec=pltpu.PrefetchScalarGridSpec(
            num_scalar_prefetch=0,
            grid=(N,),
            in_specs=[pl.BlockSpec((1, Hp2, Wp2, C),
                                   lambda n: (n, 0, 0, 0))] * 4,
            out_specs=pl.BlockSpec((1, OH, OW, C), lambda n: (n, 0, 0, 0)),
        ),
        compiler_params=pltpu.CompilerParams(
            dimension_semantics=("parallel",),
            vmem_limit_bytes=_PLAN['vmem']),
    )(*planes)


def global_avgpool(x):
    """AdaptiveAvgPool2d(1) + flatten as a per-image Pallas spatial mean."""
    N, H, W, C = x.shape
    xr = x.reshape(N, H * W, C)
    out = pl.pallas_call(
        _avgpool_kernel,
        out_shape=jax.ShapeDtypeStruct((N, 1, C), jnp.float32),
        grid_spec=pltpu.PrefetchScalarGridSpec(
            num_scalar_prefetch=0,
            grid=(N,),
            in_specs=[pl.BlockSpec((1, H * W, C), lambda n: (n, 0, 0))],
            out_specs=pl.BlockSpec((1, 1, C), lambda n: (n, 0, 0)),
        ),
        compiler_params=pltpu.CompilerParams(
            dimension_semantics=("parallel",),
            vmem_limit_bytes=_PLAN['vmem']),
    )(xr)
    return out.reshape(N, C)


# ----------------------------- parameters -----------------------------

class _Keys:
    def __init__(self, key):
        self._key = key

    def __call__(self):
        self._key, sub = jax.random.split(self._key)
        return sub


def _make_conv_bn(keys, kh, kw, cin, cout, cin_carry=None):
    """Conv + folded inference BN.  Weights stored pre-flattened as
    [kh*kw*cin_carry, Np] bf16 with the BN scale folded in, Cin padded (zero
    rows) to the lane-padded channel count actually carried by the input
    activation, and Cout padded (zero cols) to a multiple of 128."""
    if cin_carry is None:
        cin_carry = cin
    fan_in = kh * kw * cin
    w = jax.random.normal(keys(), (kh, kw, cin, cout), jnp.float32)
    w = w * jnp.sqrt(2.0 / fan_in)                       # deterministic He init
    eps = 1e-5
    gamma = jnp.ones((cout,), jnp.float32)
    beta = jnp.zeros((cout,), jnp.float32)
    rmean = jnp.zeros((cout,), jnp.float32)
    rvar = jnp.ones((cout,), jnp.float32)
    scale = gamma / jnp.sqrt(rvar + eps)
    bias = beta - rmean * scale

    Np = _round_up(cout, _LANE)
    K = kh * kw * cin_carry
    Kp, _ = _k_plan(K)
    w_full = jnp.zeros((kh, kw, cin_carry, Np), jnp.float32)
    w_full = w_full.at[:, :, :cin, :cout].set(w * scale[None, None, None, :])
    w2d = jnp.zeros((Kp, Np), jnp.float32).at[:K, :].set(w_full.reshape(K, Np))
    b2d = jnp.zeros((1, Np), jnp.float32).at[0, :cout].set(bias)
    return dict(w=w2d.astype(jnp.bfloat16), bias=b2d, kh=kh, kw=kw,
                cout=cout, np=Np, cin_carry=cin_carry)


def build_resnet50_params(seed=0):
    keys = _Keys(jax.random.PRNGKey(seed))
    params = {'conv1': _make_conv_bn(keys, 7, 7, 3, 64), 'layers': []}
    cin, cin_carry = 64, 128      # stem output: 64 real channels carried as 128
    cfg = [(3, 64), (4, 128), (6, 256), (3, 512)]         # resnet50
    for li, (blocks, width) in enumerate(cfg):
        layer = []
        w_carry = _round_up(width, _LANE)
        for b in range(blocks):
            stride = 2 if (li > 0 and b == 0) else 1
            blk = {
                'conv1': _make_conv_bn(keys, 1, 1, cin, width, cin_carry),
                'conv2': _make_conv_bn(keys, 3, 3, width, width, w_carry),
                'conv3': _make_conv_bn(keys, 1, 1, width, width * 4, w_carry),
            }
            if stride != 1 or cin != width * 4:
                blk['downsample'] = _make_conv_bn(keys, 1, 1, cin, width * 4,
                                                  cin_carry)
            layer.append(blk)
            cin, cin_carry = width * 4, _round_up(width * 4, _LANE)
        params['layers'].append(layer)
    return params


# ----------------------------- model forward -----------------------------

def bottleneck(x, blk, stride):
    identity = x
    out = conv_bn_act(x, blk['conv1'], stride=1, pad=0, relu=True)
    out = conv_bn_act(out, blk['conv2'], stride=stride, pad=1, relu=True)
    if 'downsample' in blk:
        identity = conv_bn_act(x, blk['downsample'], stride=stride, pad=0,
                               relu=False)
    # residual add + final ReLU fused into the conv3 matmul epilogue
    out = conv_bn_act(out, blk['conv3'], stride=1, pad=0, relu=True,
                      residual=identity)
    return out


def simclr_resnet50_extract(x_nchw, params):
    """Equivalent of SimCLRResNet50Extractor.forward: resnet50, fc=Identity."""
    x = jnp.transpose(x_nchw, (0, 2, 3, 1)).astype(jnp.bfloat16)   # NCHW->NHWC
    x = conv_bn_act(x, params['conv1'], stride=2, pad=3, relu=True)
    x = maxpool_3x3_s2(x)
    for li, layer in enumerate(params['layers']):
        for bi, blk in enumerate(layer):
            stride = 2 if (li > 0 and bi == 0) else 1
            x = bottleneck(x, blk, stride)
    return global_avgpool(x)                 # [N, 2048] f32; model.fc == Identity


# ----------------------------- self checks -----------------------------

def _reference_checks():
    """Cheap numerical checks of the custom kernels against XLA references."""
    key = jax.random.PRNGKey(1)
    k1, k2, k3 = jax.random.split(key, 3)

    # fused direct 3x3/s1 conv + folded BN + ReLU
    p = _make_conv_bn(_Keys(k1), 3, 3, 128, 128)
    x = jax.random.normal(k2, (2, 8, 8, 128), jnp.float32).astype(jnp.bfloat16)
    got = conv_bn_act(x, p, stride=1, pad=1, relu=True).astype(jnp.float32)
    w4 = p['w'].astype(jnp.float32).reshape(3, 3, 128, 128)
    ref = jax.lax.conv_general_dilated(
        x.astype(jnp.float32), w4, (1, 1), ((1, 1), (1, 1)),
        dimension_numbers=('NHWC', 'HWIO', 'NHWC'))
    ref = jnp.maximum(ref + p['bias'].reshape(1, 1, 1, -1), 0.0)
    assert jnp.allclose(got, ref, atol=5e-2, rtol=5e-2), "conv3x3 mismatch"

    # 1x1 conv (matmul path) + residual + ReLU
    p1 = _make_conv_bn(_Keys(k3), 1, 1, 128, 256)
    x1 = jax.random.normal(k1, (2, 4, 4, 128), jnp.float32).astype(jnp.bfloat16)
    r1 = jax.random.normal(k2, (2, 4, 4, 256), jnp.float32).astype(jnp.bfloat16)
    got = conv_bn_act(x1, p1, stride=1, pad=0, relu=True,
                      residual=r1).astype(jnp.float32)
    ref = jnp.einsum('nhwc,co->nhwo', x1.astype(jnp.float32),
                     p1['w'].astype(jnp.float32))
    ref = jnp.maximum(ref + p1['bias'].reshape(1, 1, 1, -1)
                      + r1.astype(jnp.float32), 0.0)
    assert jnp.allclose(got, ref, atol=5e-2, rtol=5e-2), "1x1 conv mismatch"

    # 3x3/2 max pool
    xm = jax.random.normal(k3, (2, 16, 16, 128), jnp.float32).astype(jnp.bfloat16)
    got = maxpool_3x3_s2(xm).astype(jnp.float32)
    ref = jax.lax.reduce_window(
        xm.astype(jnp.float32), -jnp.inf, jax.lax.max,
        (1, 3, 3, 1), (1, 2, 2, 1), ((0, 0), (1, 1), (1, 1), (0, 0)))
    assert jnp.allclose(got, ref, atol=1e-3, rtol=1e-3), "maxpool mismatch"


if __name__ == "__main__":
    _reference_checks()

    key = jax.random.PRNGKey(0)
    # small NCHW input consistent with resnet50 (3 input channels)
    x = jax.random.normal(key, (2, 3, 32, 32), jnp.float32)
    params = build_resnet50_params(seed=0)
    fwd = jax.jit(lambda inp: simclr_resnet50_extract(inp, params))
    feats = jax.block_until_ready(fwd(x))
    assert feats.shape == (2, 2048), feats.shape
    assert bool(jnp.all(jnp.isfinite(feats)))
    print("KERNEL_OK")
</pallas_src>

<mosaic_0001>
module attributes {stable_mosaic.version = 11 : i64} {
  func.func @_conv3x3_s1_kernel(%arg0: i32, %arg1: i32, %arg2: memref<1x10x16x128xbf16, #tpu.memory_space<vmem>>, %arg3: memref<3x384x128xbf16, #tpu.memory_space<vmem>>, %arg4: memref<1x128xf32, #tpu.memory_space<vmem>>, %arg5: memref<1x8x8x128xbf16, #tpu.memory_space<vmem>>) attributes {dimension_semantics = [#tpu.dimension_semantics<parallel>, #tpu.dimension_semantics<parallel>], iteration_bounds = array<i64: 2, 1>, scalar_prefetch = 0 : i64, scratch_operands = 0 : i64, tpu.core_type = #tpu.core_type<tc>, window_params = [{transform_indices = @transform_0, window_bounds = array<i64: 1, 10, 16, 128>}, {transform_indices = @transform_1, window_bounds = array<i64: 3, 384, 128>}, {transform_indices = @transform_2, window_bounds = array<i64: 1, 128>}, {transform_indices = @transform_3, window_bounds = array<i64: 1, 8, 8, 128>}]} {
    %c0 = arith.constant 0 : index
    %c0_0 = arith.constant 0 : index
    %c0_1 = arith.constant 0 : index
    %c0_2 = arith.constant 0 : index
    %0 = vector.load %arg2[%c0, %c0_0, %c0_1, %c0_2] : memref<1x10x16x128xbf16, #tpu.memory_space<vmem>>, vector<1x10x16x128xbf16>
    %1 = vector.shape_cast %0 : vector<1x10x16x128xbf16> to vector<10x16x128xbf16>
    %c0_3 = arith.constant 0 : index
    %c0_4 = arith.constant 0 : index
    %2 = vector.load %arg4[%c0_3, %c0_4] : memref<1x128xf32, #tpu.memory_space<vmem>>, vector<1x128xf32>
    %3 = vector.shape_cast %2 : vector<1x128xf32> to vector<1x128xf32>
    %4 = vector.broadcast %3 : vector<1x128xf32> to vector<128x128xf32>
    %5 = vector.extract_strided_slice %1 {offsets = [0, 0, 0], sizes = [8, 16, 128], strides = [1, 1, 1]} : vector<10x16x128xbf16> to vector<8x16x128xbf16>
    %6 = vector.shape_cast %5 : vector<8x16x128xbf16> to vector<128x128xbf16>
    %7 = vector.extract_strided_slice %6 {offsets = [1, 0], sizes = [127, 128], strides = [1, 1]} : vector<128x128xbf16> to vector<127x128xbf16>
    %cst = arith.constant 0.000000e+00 : bf16
    %8 = vector.broadcast %cst : bf16 to vector<1x128xbf16>
    %9 = tpu.concatenate %7, %8 in 0 : vector<127x128xbf16>, vector<1x128xbf16> -> vector<128x128xbf16>
    %10 = vector.extract_strided_slice %6 {offsets = [2, 0], sizes = [126, 128], strides = [1, 1]} : vector<128x128xbf16> to vector<126x128xbf16>
    %cst_5 = arith.constant 0.000000e+00 : bf16
    %11 = vector.broadcast %cst_5 : bf16 to vector<2x128xbf16>
    %12 = tpu.concatenate %10, %11 in 0 : vector<126x128xbf16>, vector<2x128xbf16> -> vector<128x128xbf16>
    %13 = tpu.concatenate %6, %9, %12 in 1 : vector<128x128xbf16>, vector<128x128xbf16>, vector<128x128xbf16> -> vector<128x384xbf16>
    %c0_6 = arith.constant 0 : index
    %c0_7 = arith.constant 0 : index
    %c0_8 = arith.constant 0 : index
    %14 = vector.load %arg3[%c0_6, %c0_7, %c0_8] : memref<3x384x128xbf16, #tpu.memory_space<vmem>>, vector<1x384x128xbf16>
    %15 = vector.shape_cast %14 : vector<1x384x128xbf16> to vector<384x128xbf16>
    %cst_9 = arith.constant dense<0.000000e+00> : vector<128x128xf32>
    %16 = tpu.matmul %13, %15, %cst_9 {dimension_numbers = #tpu.dot_dimension_numbers<[1], [0], [0], [1], [0, 0, 1, 1], [], []>} : vector<128x384xbf16>, vector<384x128xbf16>, vector<128x128xf32> -> vector<128x128xf32>
    %17 = arith.addf %4, %16 : vector<128x128xf32>
    %18 = vector.extract_strided_slice %1 {offsets = [1, 0, 0], sizes = [8, 16, 128], strides = [1, 1, 1]} : vector<10x16x128xbf16> to vector<8x16x128xbf16>
    %19 = vector.shape_cast %18 : vector<8x16x128xbf16> to vector<128x128xbf16>
    %20 = vector.extract_strided_slice %19 {offsets = [1, 0], sizes = [127, 128], strides = [1, 1]} : vector<128x128xbf16> to vector<127x128xbf16>
    %cst_10 = arith.constant 0.000000e+00 : bf16
    %21 = vector.broadcast %cst_10 : bf16 to vector<1x128xbf16>
    %22 = tpu.concatenate %20, %21 in 0 : vector<127x128xbf16>, vector<1x128xbf16> -> vector<128x128xbf16>
    %23 = vector.extract_strided_slice %19 {offsets = [2, 0], sizes = [126, 128], strides = [1, 1]} : vector<128x128xbf16> to vector<126x128xbf16>
    %cst_11 = arith.constant 0.000000e+00 : bf16
    %24 = vector.broadcast %cst_11 : bf16 to vector<2x128xbf16>
    %25 = tpu.concatenate %23, %24 in 0 : vector<126x128xbf16>, vector<2x128xbf16> -> vector<128x128xbf16>
    %26 = tpu.concatenate %19, %22, %25 in 1 : vector<128x128xbf16>, vector<128x128xbf16>, vector<128x128xbf16> -> vector<128x384xbf16>
    %c1 = arith.constant 1 : index
    %c0_12 = arith.constant 0 : index
    %c0_13 = arith.constant 0 : index
    %27 = vector.load %arg3[%c1, %c0_12, %c0_13] : memref<3x384x128xbf16, #tpu.memory_space<vmem>>, vector<1x384x128xbf16>
    %28 = vector.shape_cast %27 : vector<1x384x128xbf16> to vector<384x128xbf16>
    %cst_14 = arith.constant dense<0.000000e+00> : vector<128x128xf32>
    %29 = tpu.matmul %26, %28, %cst_14 {dimension_numbers = #tpu.dot_dimension_numbers<[1], [0], [0], [1], [0, 0, 1, 1], [], []>} : vector<128x384xbf16>, vector<384x128xbf16>, vector<128x128xf32> -> vector<128x128xf32>
    %30 = arith.addf %17, %29 : vector<128x128xf32>
    %31 = vector.extract_strided_slice %1 {offsets = [2, 0, 0], sizes = [8, 16, 128], strides = [1, 1, 1]} : vector<10x16x128xbf16> to vector<8x16x128xbf16>
    %32 = vector.shape_cast %31 : vector<8x16x128xbf16> to vector<128x128xbf16>
    %33 = vector.extract_strided_slice %32 {offsets = [1, 0], sizes = [127, 128], strides = [1, 1]} : vector<128x128xbf16> to vector<127x128xbf16>
    %cst_15 = arith.constant 0.000000e+00 : bf16
    %34 = vector.broadcast %cst_15 : bf16 to vector<1x128xbf16>
    %35 = tpu.concatenate %33, %34 in 0 : vector<127x128xbf16>, vector<1x128xbf16> -> vector<128x128xbf16>
    %36 = vector.extract_strided_slice %32 {offsets = [2, 0], sizes = [126, 128], strides = [1, 1]} : vector<128x128xbf16> to vector<126x128xbf16>
    %cst_16 = arith.constant 0.000000e+00 : bf16
    %37 = vector.broadcast %cst_16 : bf16 to vector<2x128xbf16>
    %38 = tpu.concatenate %36, %37 in 0 : vector<126x128xbf16>, vector<2x128xbf16> -> vector<128x128xbf16>
    %39 = tpu.concatenate %32, %35, %38 in 1 : vector<128x128xbf16>, vector<128x128xbf16>, vector<128x128xbf16> -> vector<128x384xbf16>
    %c2 = arith.constant 2 : index
    %c0_17 = arith.constant 0 : index
    %c0_18 = arith.constant 0 : index
    %40 = vector.load %arg3[%c2, %c0_17, %c0_18] : memref<3x384x128xbf16, #tpu.memory_space<vmem>>, vector<1x384x128xbf16>
    %41 = vector.shape_cast %40 : vector<1x384x128xbf16> to vector<384x128xbf16>
    %cst_19 = arith.constant dense<0.000000e+00> : vector<128x128xf32>
    %42 = tpu.matmul %39, %41, %cst_19 {dimension_numbers = #tpu.dot_dimension_numbers<[1], [0], [0], [1], [0, 0, 1, 1], [], []>} : vector<128x384xbf16>, vector<384x128xbf16>, vector<128x128xf32> -> vector<128x128xf32>
    %43 = arith.addf %30, %42 : vector<128x128xf32>
    %cst_20 = arith.constant 0.000000e+00 : f32
    %44 = vector.broadcast %cst_20 : f32 to vector<128x128xf32>
    %45 = arith.maximumf %43, %44 : vector<128x128xf32>
    %46 = vector.shape_cast %45 : vector<128x128xf32> to vector<8x16x128xf32>
    %47 = vector.extract_strided_slice %46 {offsets = [0, 0, 0], sizes = [8, 8, 128], strides = [1, 1, 1]} : vector<8x16x128xf32> to vector<8x8x128xf32>
    %48 = arith.truncf %47 : vector<8x8x128xf32> to vector<8x8x128xbf16>
    %c0_21 = arith.constant 0 : index
    %c0_22 = arith.constant 0 : index
    %c0_23 = arith.constant 0 : index
    %c0_24 = arith.constant 0 : index
    %49 = vector.load %arg5[%c0_21, %c0_22, %c0_23, %c0_24] : memref<1x8x8x128xbf16, #tpu.memory_space<vmem>>, vector<1x8x8x128xbf16>
    %50 = vector.shape_cast %49 : vector<1x8x8x128xbf16> to vector<8x8x128xbf16>
    %51 = vector.shape_cast %48 : vector<8x8x128xbf16> to vector<1x8x8x128xbf16>
    tpu.vector_store %arg5[%c0_21, %c0_22, %c0_23, %c0_24], %51 {strides = array<i32>} : memref<1x8x8x128xbf16, #tpu.memory_space<vmem>>, vector<1x8x8x128xbf16>,
    return
  }
  func.func @transform_0(%arg0: i32, %arg1: i32) -> (i32, i32, i32, i32) {
    %c0_i32 = arith.constant 0 : i32
    %c0_i32_0 = arith.constant 0 : i32
    %c0_i32_1 = arith.constant 0 : i32
    %c0_i32_2 = arith.constant 0 : i32
    return %arg0, %c0_i32, %c0_i32_0, %c0_i32_1 : i32, i32, i32, i32
  }
  func.func @transform_1(%arg0: i32, %arg1: i32) -> (i32, i32, i32) {
    %c0_i32 = arith.constant 0 : i32
    %c0_i32_0 = arith.constant 0 : i32
    %c0_i32_1 = arith.constant 0 : i32
    return %c0_i32, %c0_i32_0, %arg1 : i32, i32, i32
  }
  func.func @transform_2(%arg0: i32, %arg1: i32) -> (i32, i32) {
    %c0_i32 = arith.constant 0 : i32
    %c0_i32_0 = arith.constant 0 : i32
    return %c0_i32, %arg1 : i32, i32
  }
  func.func @transform_3(%arg0: i32, %arg1: i32) -> (i32, i32, i32, i32) {
    %c0_i32 = arith.constant 0 : i32
    %c0_i32_0 = arith.constant 0 : i32
    %c0_i32_1 = arith.constant 0 : i32
    return %arg0, %c0_i32, %c0_i32_0, %arg1 : i32, i32, i32, i32
  }
}

</mosaic_0001>

<bundles_post_ra>
// kernel: tpu_custom_call.1
= control target key start
LH: loop header
LB: loop body
LE: loop exit
PB: predicated region body
PF: predicated region fallthrough
CT: control target
= control target key end

     0   :  { %8 = vsyncpa [#allocation3], 0  ;;  %s3038_s0 = inlined_call_operand.hbm [shape: bf16[2,10,16,128], index: 0, kind: input, shape index: {}]   ;;  %s3039_s1 = inlined_call_operand.hbm [shape: bf16[3,384,128], index: 1, kind: input, shape index: {}]   ;;  %s3040_s2 = inlined_call_operand.vmem [shape: f32[1,128], index: 2, kind: input, shape index: {}]   ;;  %s3041_s3 = inlined_call_operand.hbm [shape: bf16[2,8,8,128], index: 3, kind: output, shape index: {}]  }
   0x1   :  { %10 = vsyncpa [#allocation3 + $0x1], 0 }
   0x2   :  { %11 = vsyncpa [#allocation6], 0 }
   0x3   :  { %12 = vsyncpa [#allocation4], 0 }
   0x4   :  { %14 = vsyncpa [#allocation4 + $0x1], 0  ;;  %s2618_s12 = smov 0   ;;  %s2620_s13 = smov 0  }
   0x5   :  { %s2622_s14 = smov 0   ;;  %s2624_s15 = smov 0  }
   0x6   :  { %s2626_s16 = smov 0   ;;  %s2628_s17 = smov 0  }
   0x7 LB: > { %s1746_s18 = sadd.s32 4294967295, %s2589_s17   ;;  %s1747_s19 = sadd.s32 4294967294, %s2589_s17   ;;  %s2589_s17 = sphi %s2628_s17, %s20_s17   ;;  %s2585_s16 = sphi %s2626_s16, %s3066_s16   ;;  %s2581_s15 = sphi %s2624_s15, %s3065_s15   ;;  %s2577_s14 = sphi %s2622_s14, %s3064_s14   ;;  %s2573_s13 = sphi %s2620_s13, %s3063_s13   ;;  %s2569_s12 = sphi %s2618_s12, %s3062_s12  }
   0x8   : > { %p52_p0 = scmp.ne.s32.totalorder %s2573_s13, %s2569_s12  ;;  %p2652_p1 = scmp.eq.s32.totalorder %s1746_s18, 0 }
   0x9   : > { %p2656_p2 = scmp.eq.s32.totalorder %s1746_s18, 1  ;;  %p136_p3 = scmp.eq.s32.totalorder %s1747_s19, 1 }
   0xa   : > { %s3046_s20 = scalar_select %p2652_p1, 1, 0 }
   0xb   : > { %s3047_s21 = scalar_select %p2656_p2, 1, 0 }
   0xc   : > { %p2662_p4 = por %p2652_p1, %p52_p0  ;;  %p1748_p5 = scmp.ge.s32.totalorder %s2589_s17, 1 }
   0xd   : > { %p2667_p6 = por %p136_p3, %p52_p0  ;;  %p143_p7 = scmp.lt.s32.totalorder %s2589_s17, 3 }
   0xe   : > { %s3048_s22 = scalar_select %p2662_p4, 1, 0 }
   0xf   : > { %s3049_s23 = scalar_select %p2667_p6, 1, 0 }
  0x10   : > { %p2672_p8 = pnand %p1748_p5, %p143_p7  ;;  %s2591_s25 = smov [#allocation5]  }
  0x11   : > { %s157_s26 = sshll.u32 %s2591_s25, 4  ;;  %s32_s28 = sadd.s32 1, %s2585_s16  ;;  %s158_s26 = int_to_ptr.vmem [resolvable:$true] %s157_s26 }
  0x12   : > { %s3050_s24 = scalar_select %p2672_p8, 1, 0 }
  0x13   : > { %p2294_p9 = pneg %p2672_p8  ;;  %s2445_s4 = scalar_lea.hbm %s3039_s1, 9216 }
  0x14   : > { %p2446_p12 = scmp.ne.s32.totalorder %s3039_s1, %s2445_s4  ;;  %p2452_p5 = scmp.lt.u32.totalorder %s2445_s4, %s3039_s1 }
  0x15   : > { %p2681_p11 = pnand %p2294_p9, %p2652_p1 }
  0x17   : > { %p2447_p13 = pneg %p2681_p11 }
  0x19   : > { %p2448_p0 = pnand %p2447_p13, %p2446_p12 }
  0x1b   : > { %p2449_p3 = pneg %p2448_p0 }
  0x1d   : > { %p2454_p7 = pnand %p2452_p5, %p2449_p3 }
  0x1f   : > { %2457 = shalt.err (!%p2454_p7)
}
  0x20   : > { %s2458_s9 = scalar_lea.vmem %s158_s26, 9216  ;;  %p2466_p1 = scmp.lt.s32.totalorder %s158_s26, %s158_s26 }
  0x21   : > { %p2459_p9 = scmp.ne.s32.totalorder %s158_s26, %s2458_s9  ;;  %p2467_p4 = scmp.lt.s32.totalorder %s2458_s9, %s2458_s9 }
  0x23   : > { %p2461_p10 = pnand %p2459_p9, %p2447_p13  ;;  %p2468_p8 = por %p2467_p4, %p2466_p1 }
  0x25   : > { %p2462_p6 = pneg %p2461_p10 }
  0x27   : > { %p2469_p2 = pnand %p2468_p8, %p2462_p6 }
  0x29   : > { %2472 = shalt.err (!%p2469_p2)
}
  0x2a   : > { %s2592_s10 = smov 64   ;;  %s2593_s11 = smov 4  }
  0x2b   : > { %2297 = dma.hbm_to_vmem [thread:$0]  (!%p2681_p11), %s3039_s1, 9216, %s158_s26, [#allocation6], %s2592_s10, %s2592_s10, %s2593_s11  }
  0x2c   : > { %p34_p1 = scmp.ge.s32.totalorder %s32_s28, 2  ;;  %s39_s25 = sadd.s32 1, %s2577_s14 }
  0x2d   : > { %p46_p2 = scmp.ne.s32.totalorder %s2577_s14, %s2573_s13  ;;  %p47_p4 = scmp.eq.s32.totalorder %s2589_s17, 0 }
  0x2e   : > { %s3068_s28 = smov (%p34_p1, %s32_s28), 0  ;;  %p3052_p8 = scmp.ne.s32.totalorder %s3047_s21, 0 }
  0x2f   : > { %p48_p6 = por %p47_p4, %p46_p2  ;;  %s36_s27 = ssub.s32 %s2585_s16, %s3068_s28 }
  0x30   : > { %p2713_p10 = por %p3052_p8, %p46_p2  ;;  %p2307_p12 = scmp.lt.s32.totalorder %s2589_s17, 2 }
  0x31   : > { %p37_p13 = scmp.eq.s32.totalorder %s36_s27, 0  ;;  %s177_s30 = sand.u32 1, %s2577_s14  }
  0x32   : > { %s2283_s4 = smul.u32 80, %s177_s30  ;;  %p2725_p11 = pnand %p2307_p12, %p48_p6 }
  0x33   : > { %s2722_s5 = scalar_select %p37_p13, %s2577_s14, %s39_s25  }
  0x34   : > { %s2284_s26 = smul.u32 1280, %s2585_s16  ;;  %s181_s6 = scalar_lea.vmem [#allocation2], %s2283_s4 }
  0x35   : > { %s188_s7 = sshll.u32 %s181_s6, 4  ;;  %s2736_s19 = scalar_lea.sflag [#allocation3], %s177_s30  ;;  %s2734_s7 = int_to_ptr.vmem [resolvable:$true] %s188_s7 }
  0x36   : > { %s2732_s18 = scalar_lea.hbm %s3038_s0, %s2284_s26  ;;  %p2475_p3 = pneg %p2725_p11 }
  0x37   : > { %s2473_s25 = scalar_lea.hbm %s2732_s18, 1280  ;;  %s2478_s26 = scalar_lea.hbm %s3038_s0, 2560 }
  0x38   : > { %p2474_p0 = scmp.ne.s32.totalorder %s2732_s18, %s2473_s25  ;;  %p2479_p9 = scmp.lt.u32.totalorder %s2732_s18, %s3038_s0 }
  0x39   : > { %p2480_p1 = scmp.lt.u32.totalorder %s2478_s26, %s2473_s25  ;;  %p2482_p4 = scmp.lt.u32.totalorder %s2473_s25, %s2732_s18 }
  0x3a   : > { %p2476_p5 = pnand %p2475_p3, %p2474_p0 }
  0x3b   : > { %p2481_p2 = por %p2480_p1, %p2479_p9 }
  0x3c   : > { %p2477_p7 = pneg %p2476_p5 }
  0x3d   : > { %p2483_p6 = por %p2482_p4, %p2481_p2 }
  0x3f   : > { %p2484_p8 = pnand %p2483_p6, %p2477_p7 }
  0x41   : > { %2487 = shalt.err (!%p2484_p8)
}
  0x42   : > { %s2488_s30 = scalar_lea.vmem %s2734_s7, 1280  ;;  %s2594_s21 = smov [#allocation2]  }
  0x43   : > { %p2489_p12 = scmp.ne.s32.totalorder %s2734_s7, %s2488_s30  ;;  %s2493_s27 = sshll.u32 %s2594_s21, 4  ;;  %s2494_s27 = int_to_ptr.vmem [resolvable:$false] %s2493_s27 }
  0x44   : > { %s2495_s4 = scalar_lea.vmem %s2494_s27, 2560  ;;  %p2496_p5 = scmp.lt.s32.totalorder %s2734_s7, %s2494_s27 }
  0x45   : > { %p2491_p13 = pnand %p2489_p12, %p2475_p3  ;;  %p2497_p9 = scmp.lt.s32.totalorder %s2495_s4, %s2488_s30 }
  0x47   : > { %p2492_p0 = pneg %p2491_p13  ;;  %p2498_p1 = por %p2497_p9, %p2496_p5 }
  0x49   : > { %p2499_p2 = pnand %p2498_p1, %p2492_p0 }
  0x4b   : > { %2502 = shalt.err (!%p2499_p2)
}
  0x4c   : > { %2301 = dma.hbm_to_vmem [thread:$0]  (!%p2725_p11), %s2732_s18, 1280, %s2734_s7, %s2736_s19, %s2592_s10, %s2592_s10, %s2593_s11  }
  0x4d   : > { %p3055_p3 = scmp.ne.s32.totalorder %s3050_s24, 0 }
  0x4e   : > { %s2770_s25 = sand.u32 (!%p3055_p3), 1, %s2573_s13   ;;  %p3056_p7 = scmp.ne.s32.totalorder (!%p3055_p3), %s3048_s22, 0 }
  0x4f   : > { %200 = sbr.rel (%p3055_p3) target bundleno = 494 (0x1ee), region = 32  ;;  %s203_s6 = scalar_lea.sflag (!%p3055_p3), [#allocation3], %s2770_s25 }
  0x50   : > { %s2285_s26 = smul.u32 (!%p3055_p3), 80, %s2770_s25 }
  0x52   : > { %s2774_s9 = scalar_lea.vmem (!%p3055_p3), [#allocation2], %s2285_s26 }
  0x56   : > { %2556 = dma.done.wait (%p3056_p7), %s203_s6, 1280  }
  0x57   : > { %2558 = vsyncadd (%p3056_p7), %s203_s6, 4294966016  ;;  %p3057_p11 = scmp.ne.s32.totalorder %s3046_s20, 0 }
  0x59   : > { %2560 = dma.done.wait (%p3057_p11), [#allocation6], 9216  }
  0x5a   : > { %2562 = vsyncadd (%p3057_p11), [#allocation6], 4294958080  ;;  %v2363_v0 = vld [vmem:[#allocation5 + $0x40] sm:$0xff]   ;;  %v2366_v3 = vld [vmem:[#allocation5 + $0x48] sm:$0xff]   ;;  %vm307_vm0 = vsmask.f32 7424 }
  0x5b   : > { %v2364_v1 = vld [vmem:[#allocation5 + $0x80] sm:$0xff]   ;;  %1871 = vmatprep.subr.bf16.mxu0 %v2363_v0  ;;  %v2367_v4 = vld [vmem:[#allocation5 + $0x88] sm:$0xff]   ;;  %v2369_v6 = vld [vmem:[#allocation5 + $0x50] sm:$0xff]   ;;  %vm382_vm1 = vcmask 1046528   ;;  %vm379_vm2 = vcmask 1047552   ;;  %s1755_s24 = sshll.u32 %s2770_s25, 5 }
  0x5c   : > { %v2365_v2 = vld [vmem:[#allocation5] sm:$0xff]   ;;  %2111 = vmatprep.subr.bf16.mxu1 %v2364_v1  ;;  %v2368_v5 = vld [vmem:[#allocation5 + $0x8] sm:$0xff]   ;;  %v2370_v7 = vld [vmem:[#allocation5 + $0x90] sm:$0xff]   ;;  %s235_s10 = scalar_lea.vmem [#allocation7], %s1755_s24  ;;  %s1847_s7 = sshll.u32 %s2581_s15, 9 }
  0x5d   : > { %1872 = vmatpush3.bf16.msra.mxu0 %v2365_v2  ;;  %2112 = vmatpush3.bf16.msra.mxu1 %v2364_v1  ;;  %v2371_v8 = vld [vmem:[#allocation5 + $0x10] sm:$0xff]   ;;  %v2372_v9 = vld [vmem:[#allocation5 + $0x58] sm:$0xff]   ;;  %v2375_v12 = vld [vmem:[#allocation5 + $0x60] sm:$0xff]   ;;  %s1639_s11 = sshll.u32 %s235_s10, 4  ;;  %s2989_s19 = scalar_lea.hbm %s3041_s3, %s1847_s7  ;;  %s2984_s11 = int_to_ptr.vmem [resolvable:$true] %s1639_s11 }
  0x5e   : > { %1873 = vmatprep.subr.bf16.mxu0 %v2366_v3  ;;  %2113 = vmatprep.subr.bf16.mxu1 %v2367_v4  ;;  %v2373_v10 = vld [vmem:[#allocation5 + $0x98] sm:$0xff]   ;;  %v2376_v13 = vld [vmem:[#allocation5 + $0xa0] sm:$0xff]   ;;  %v2378_v15 = vld [vmem:[#allocation5 + $0x68] sm:$0xff]   ;;  %s1625_s15 = scalar_lea.sflag [#allocation4], %s2770_s25  ;;  %s2503_s30 = scalar_lea.vmem %s2984_s11, 512 }
  0x5f   : > { %v2374_v11 = vld [vmem:[#allocation5 + $0x18] sm:$0xff]   ;;  %v2377_v14 = vld [vmem:[#allocation5 + $0x20] sm:$0xff]   ;;  %v2379_v16 = vld [vmem:[#allocation5 + $0xa8] sm:$0xff]   ;;  %p2504_p4 = scmp.ne.s32.totalorder %s2984_s11, %s2503_s30  ;;  %s2595_s21 = smov [#allocation7]  }
  0x60   : > { %v2380_v17 = vld [vmem:[#allocation5 + $0x28] sm:$0xff]   ;;  %v2381_v18 = vld [vmem:[#allocation5 + $0x70] sm:$0xff]   ;;  %v2384_v21 = vld [vmem:[#allocation5 + $0x78] sm:$0xff]   ;;  %s2507_s27 = sshll.u32 %s2595_s21, 4  ;;  %s2508_s27 = int_to_ptr.vmem [resolvable:$false] %s2507_s27 }
  0x61   : > { %1874 = vmatpush3.bf16.msra.mxu0 %v2368_v5  ;;  %2114 = vmatpush3.bf16.msra.mxu1 %v2367_v4  ;;  %v2382_v19 = vld [vmem:[#allocation5 + $0xb0] sm:$0xff]   ;;  %v2385_v22 = vld [vmem:[#allocation5 + $0xb8] sm:$0xff]   ;;  %v2390_v33 = vld [vmem:[#allocation5 + $0x100] sm:$0xff]   ;;  %p2505_p6 = pnand %p2504_p4, %p2713_p10  ;;  %s2509_s4 = scalar_lea.vmem %s2508_s27, 1024 }
  0x62   : > { %1875 = vmatprep.subr.bf16.mxu0 %v2369_v6  ;;  %2115 = vmatprep.subr.bf16.mxu1 %v2370_v7  ;;  %v2383_v20 = vld [vmem:[#allocation5 + $0x30] sm:$0xff]   ;;  %v2786_v24 = vld [vmem:[%s2774_s9 + $0x8] sm:$0xff]   ;;  %v2391_v34 = vld [vmem:[#allocation5 + $0x1c0] sm:$0xff]   ;;  %p2510_p12 = scmp.lt.s32.totalorder %s2984_s11, %s2508_s27  ;;  %p2511_p13 = scmp.lt.s32.totalorder %s2509_s4, %s2503_s30 }
  0x63   : > { %v2387_v23 = vld [vmem:[%s2774_s9] sm:$0xff]   ;;  %v2386_v25 = vld [vmem:[#allocation5 + $0x38] sm:$0xff]   ;;  %v2789_v26 = vld [vmem:[%s2774_s9 + $0x10] sm:$0xff]   ;;  %v316_v29 = vshll.u32 %v2786_v24, 16  ;;  %v384_v31 = vrot.slane %v2786_v24, 1  ;;  %v320_v38 = vshrl.u32 %v2786_v24, 16  ;;  %p2506_p8 = pneg %p2505_p6 }
  0x64   : > { %v309_v27 = vshrl.u32 %v2387_v23, 16  ;;  %v311_v28 = vshll.u32 %v2387_v23, 16  ;;  %v383_v30 = vrot.slane %v2387_v23, 1  ;;  %v386_v32 = vrot.slane %v2789_v26, 1  ;;  %v2392_v40 = vld [vmem:[#allocation5 + $0xc0] sm:$0xff]   ;;  %v2394_v46 = vld [vmem:[#allocation5 + $0x108] sm:$0xff]   ;;  %vm2895_vm3 = vmand %vm379_vm2, %vm307_vm0  ;;  %p2512_p0 = por %p2511_p13, %p2510_p12 }
  0x65   : > { %1876 = vmatpush3.bf16.msra.mxu0 %v2371_v8  ;;  %2116 = vmatpush3.bf16.msra.mxu1 %v2370_v7  ;;  %v318_v36 = vrot.slane %v316_v29, 1  ;;  %v324_v41 = vshll.u32 %v2789_v26, 16  ;;  %v2393_v43 = vld [vmem:[#allocation5 + $0x180] sm:$0xff]   ;;  %v2395_v48 = vld [vmem:[#allocation5 + $0xc8] sm:$0xff]   ;;  %v328_v50 = vshrl.u32 %v2789_v26, 16  ;;  %v2398_v54 = vld [vmem:[#allocation5 + $0x110] sm:$0xff]  }
  0x66   : > { %1877 = vmatprep.subr.bf16.mxu0 %v2372_v9  ;;  %2117 = vmatprep.subr.bf16.mxu1 %v2373_v10  ;;  %v313_v35 = vrot.slane %v311_v28, 1  ;;  %v385_v37 = vsel %vm382_vm1, %v383_v30, %v384_v31  ;;  %v2798_v42 = vsel %vm382_vm1, %v384_v31, %v386_v32  ;;  %v2802_v49 = vld [vmem:[%s2774_s9 + $0x18] sm:$0xff]   ;;  %v2810_v52 = vld [vmem:[%s2774_s9 + $0x20] sm:$0xff]   ;;  %v2829_v5 = vld [vmem:[%s2774_s9 + $0x28] sm:$0xff]   ;;  %p2513_p5 = pnand %p2512_p0, %p2506_p8 }
  0x67   : > { %2127 = vmatprep.mubr.bf16.mxu1 %v385_v37  ;;  %v322_v44 = vor.u32 %v320_v38, %v318_v36  ;;  %v326_v47 = vrot.slane %v324_v41, 1  ;;  %v388_v53 = vrot.slane %v2802_v49, 1  ;;  %v390_v55 = vrot.slane %v2810_v52, 1  ;;  %v2399_v56 = vld [vmem:[#allocation5 + $0x1c8] sm:$0xff]   ;;  %v2400_v58 = vld [vmem:[#allocation5 + $0xd0] sm:$0xff]   ;;  %v2402_v1 = vld [vmem:[#allocation5 + $0x118] sm:$0xff]  }
  0x68   : > { %v314_v39 = vor.u32 %v313_v35, %v309_v27  ;;  %v332_v60 = vshll.u32 %v2802_v49, 16  ;;  %v2401_v61 = vld [vmem:[#allocation5 + $0x188] sm:$0xff]   ;;  %v336_v0 = vshrl.u32 %v2802_v49, 16  ;;  %v340_v2 = vshll.u32 %v2810_v52, 16  ;;  %v2403_v3 = vld [vmem:[#allocation5 + $0xd8] sm:$0xff]   ;;  %v2834_v6 = vld [vmem:[%s2774_s9 + $0x30] sm:$0xff]  }
  0x69   : > { %1878 = vmatpush3.bf16.msra.mxu0 %v2374_v11  ;;  %2118 = vmatpush3.bf16.msra.mxu1 %v2373_v10  ;;  %v2807_v51 = vsel %vm307_vm0, %v322_v44, %v326_v47  ;;  %v2816_v57 = vsel %vm382_vm1, %v386_v32, %v388_v53  ;;  %v330_v59 = vor.u32 %v328_v50, %v326_v47  ;;  %v392_v8 = vrot.slane %v2829_v5, 1  ;;  %v2406_v9 = vld [vmem:[#allocation5 + $0x120] sm:$0xff]   ;;  %v2407_v11 = vld [vmem:[#allocation5 + $0x1d0] sm:$0xff]   ;;  %v2416_v31 = vld [vmem:[#allocation5 + $0x198] sm:$0xff]  }
  0x6a   : > { %1879 = vmatprep.subr.bf16.mxu0 %v2375_v12  ;;  %2119 = vmatprep.subr.bf16.mxu1 %v2376_v13  ;;  %v319_v45 = vsel %vm307_vm0, %v314_v39, %v318_v36  ;;  %v2821_v62 = vsel %vm382_vm1, %v388_v53, %v390_v55  ;;  %v334_v63 = vrot.slane %v332_v60, 1  ;;  %v342_v7 = vrot.slane %v340_v2, 1  ;;  %v2413_v27 = vld [vmem:[#allocation5 + $0x130] sm:$0xff]   ;;  %v2418_v37 = vld [vmem:[#allocation5 + $0xf8] sm:$0xff]   ;;  %v2420_v38 = vld [vmem:[#allocation5 + $0x1e0] sm:$0xff]  }
  0x6b   : > { %642 = vmatprep.mubr.bf16.mxu0 %v319_v45  ;;  %v394_v10 = vrot.slane %v2834_v6, 1  ;;  %v2415_v32 = vld [vmem:[#allocation5 + $0xf0] sm:$0xff]   ;;  %v356_v36 = vshll.u32 %v2834_v6, 16  ;;  %v2421_v39 = vld [vmem:[#allocation5 + $0x1a0] sm:$0xff]   ;;  %v2423_v44 = vld [vmem:[#allocation5 + $0x1e8] sm:$0xff]   ;;  %v360_v45 = vshrl.u32 %v2834_v6, 16 }
  0x6c   : > { %v2826_v4 = vsel %vm307_vm0, %v330_v59, %v334_v63  ;;  %v338_v12 = vor.u32 %v336_v0, %v334_v63  ;;  %v2422_v47 = vld [vmem:[#allocation5 + $0x148] sm:$0xff]   ;;  %v2429_v60 = vld [vmem:[#allocation5 + $0x1f8] sm:$0xff]   ;;  %v2890_v63 = vld [vmem:[#allocation5 + $0x200] sm:$0xff]  }
  0x6d   : > { %1880 = vmatpush3.bf16.msra.mxu0 %v2377_v14  ;;  %2120 = vmatpush3.bf16.msra.mxu1 %v2376_v13  ;;  %v2840_v13 = vsel %vm382_vm1, %v390_v55, %v392_v8  ;;  %v2409_v14 = vld [vmem:[#allocation5 + $0x190] sm:$0xff]   ;;  %v2424_v50 = vld [vmem:[#allocation5 + $0x1a8] sm:$0xff]   ;;  %v2431_v2 = vld [vmem:[#allocation5 + $0x160] sm:$0xff]  }
  0x6e   : > { %1881 = vmatprep.subr.bf16.mxu0 %v2378_v15  ;;  %2121 = vmatprep.subr.bf16.mxu1 %v2379_v16  ;;  %v2844_v15 = vsel %vm382_vm1, %v392_v8, %v394_v10  ;;  %v2425_v55 = vld [vmem:[#allocation5 + $0x150] sm:$0xff]  }
  0x6f   : > { %v2436_v8 = vld [vmem:[#allocation5 + $0x170] sm:$0xff]  }
  0x71   : > { %1882 = vmatpush3.bf16.msra.mxu0 %v2380_v17  ;;  %2122 = vmatpush3.bf16.msra.mxu1 %v2379_v16  ;;  %v2408_v16 = vld [vmem:[#allocation5 + $0xe0] sm:$0xff]   ;;  %v344_v17 = vshrl.u32 %v2810_v52, 16 }
  0x72   : > { %1883 = vmatprep.subr.bf16.mxu0 %v2381_v18  ;;  %2123 = vmatprep.subr.bf16.mxu1 %v2382_v19  ;;  %v2410_v18 = vld [vmem:[#allocation5 + $0x128] sm:$0xff]  }
  0x73   : > { %v346_v28 = vor.u32 %v344_v17, %v342_v7 }
  0x75   : > { %1884 = vmatpush3.bf16.msra.mxu0 %v2383_v20  ;;  %2124 = vmatpush3.bf16.msra.mxu1 %v2382_v19  ;;  %v2848_v19 = vsel %vm307_vm0, %v338_v12, %v342_v7  ;;  %v348_v20 = vshll.u32 %v2829_v5, 16  ;;  %v2433_v7 = vld [vmem:[#allocation5 + $0x168] sm:$0xff]  }
  0x76   : > { %1885 = vmatprep.subr.bf16.mxu0 %v2384_v21  ;;  %2125 = vmatprep.subr.bf16.mxu1 %v2385_v22  ;;  %v2852_v21 = vld [vmem:[%s2774_s9 + $0x38] sm:$0xff]  }
  0x77   : > { %v350_v29 = vrot.slane %v348_v20, 1 }
  0x79   : > { %1886 = vmatpush3.bf16.msra.mxu0 %v2386_v25  ;;  %2126 = vmatpush3.bf16.msra.mxu1 %v2385_v22  ;;  %v2411_v22 = vld [vmem:[#allocation5 + $0xe8] sm:$0xff]   ;;  %v2414_v25 = vld [vmem:[#allocation5 + $0x1d8] sm:$0xff]   ;;  %v2867_v35 = vsel %vm307_vm0, %v346_v28, %v350_v29 }
  0x7a   : > { %1951 = vmatprep.subr.bf16.mxu1 %v2390_v33  ;;  %2031 = vmatprep.subr.bf16.mxu0 %v2391_v34  ;;  %v352_v33 = vshrl.u32 %v2829_v5, 16  ;;  %v2417_v34 = vld [vmem:[#allocation5 + $0x138] sm:$0xff]  }
  0x7c   : > { %643 = vmatmul.mubr.bf16.vlgmr.msra.gmra.mrb[0].mxu0 %v2387_v23  ;;  %2128 = vmatmul.mubr.bf16.vlgmr.msra.gmra.mrb[0].mxu1 %v2798_v42  ;;  %v2858_v23 = vrot.slane %v2852_v21, 1  ;;  %v354_v41 = vor.u32 %v352_v33, %v350_v29 }
  0x7d   : > { %1952 = vmatpush3.bf16.msra.mxu1 %v2392_v40  ;;  %2032 = vmatpush3.bf16.msra.mxu0 %v2393_v43  ;;  %v2419_v40 = vld [vmem:[#allocation5 + $0x140] sm:$0xff]   ;;  %v358_v43 = vrot.slane %v356_v36, 1 }
  0x7e   : > { %1953 = vmatprep.subr.bf16.mxu1 %v2394_v46  ;;  %649 = vmatprep.mubr.bf16.mxu0 %v2807_v51  ;;  %v2862_v30 = vsel %vm382_vm1, %v394_v10, %v2858_v23  ;;  %v2910_v10 = vld [vmem:[%s2774_s9 + $0x40] sm:$0xff]  }
  0x7f   : > { %2131 = vmatprep.mubr.bf16.mxu1 %v2816_v57  ;;  %2033 = vmatprep.subr.bf16.mxu0 %v2399_v56  ;;  %v2877_v46 = vsel %vm307_vm0, %v354_v41, %v358_v43  ;;  %v362_v53 = vor.u32 %v360_v45, %v358_v43  ;;  %v2427_v56 = vld [vmem:[#allocation5 + $0x1b0] sm:$0xff]   ;;  %v802_v12 = vshll.u32 %v2910_v10, 16  ;;  %v806_v17 = vshrl.u32 %v2910_v10, 16 }
  0x81   : > { %1954 = vmatpush3.bf16.msra.mxu1 %v2395_v48  ;;  %2034 = vmatpush3.bf16.msra.mxu0 %v2401_v61  ;;  %v364_v48 = vshll.u32 %v2852_v21, 16  ;;  %v2430_v61 = vld [vmem:[#allocation5 + $0x1b8] sm:$0xff]  }
  0x82   : > { %1955 = vmatprep.subr.bf16.mxu1 %v2398_v54  ;;  %2035 = vmatprep.subr.bf16.mxu0 %v2407_v11  ;;  %v2434_v11 = vld [vmem:[#allocation5 + $0x208] sm:$0xff]  }
  0x83   : > { %v366_v54 = vrot.slane %v364_v48, 1 }
  0x84   : > { %650 = vmatmul.mubr.bf16.gmra.mrb[4].mxu0 %v2786_v24  ;;  %2132 = vmatmul.mubr.bf16.gmra.mrb[4].mxu1 %v2821_v62 }
  0x85   : > { %1956 = vmatpush3.bf16.msra.mxu1 %v2400_v58  ;;  %656 = vmatprep.mubr.bf16.mxu0 %v2826_v4  ;;  %v2428_v58 = vld [vmem:[#allocation5 + $0x158] sm:$0xff]   ;;  %v2885_v59 = vsel %vm307_vm0, %v362_v53, %v366_v54 }
  0x86   : > { %1957 = vmatprep.subr.bf16.mxu1 %v2402_v1  ;;  %2135 = vmatprep.mubr.bf16.mxu1 %v2840_v13 }
  0x87   : > { %2036 = vmatpush3.bf16.msra.mxu0 %v2409_v14  ;;  %v2437_v14 = vld [vmem:[#allocation5 + $0x210] sm:$0xff]  }
  0x88   : > { %2037 = vmatprep.subr.bf16.mxu0 %v2414_v25  ;;  %v2444_v25 = vld [vmem:[#allocation5 + $0x238] sm:$0xff]  }
  0x89   : > { %1958 = vmatpush3.bf16.msra.mxu1 %v2403_v3 }
  0x8a   : > { %1959 = vmatprep.subr.bf16.mxu1 %v2406_v9  ;;  %v2438_v9 = vld [vmem:[#allocation5 + $0x178] sm:$0xff]  }
  0x8b   : > { %2038 = vmatpush3.bf16.msra.mxu0 %v2416_v31 }
  0x8c   : > { %657 = vmatmul.mubr.bf16.gmra.mrb[8].mxu0 %v2789_v26  ;;  %2136 = vmatmul.mubr.bf16.gmra.mrb[8].mxu1 %v2844_v15 }
  0x8d   : > { %1960 = vmatpush3.bf16.msra.mxu1 %v2408_v16  ;;  %663 = vmatprep.mubr.bf16.mxu0 %v2848_v19 }
  0x8e   : > { %1961 = vmatprep.subr.bf16.mxu1 %v2410_v18  ;;  %2139 = vmatprep.mubr.bf16.mxu1 %v2862_v30  ;;  %v2439_v18 = vld [vmem:[#allocation5 + $0x218] sm:$0xff]  }
  0x8f   : > { %2039 = vmatprep.subr.bf16.mxu0 %v2420_v38 }
  0x90   : > { %2040 = vmatpush3.bf16.msra.mxu0 %v2421_v39 }
  0x91   : > { %1962 = vmatpush3.bf16.msra.mxu1 %v2411_v22  ;;  %2041 = vmatprep.subr.bf16.mxu0 %v2423_v44  ;;  %v2441_v22 = vld [vmem:[#allocation5 + $0x228] sm:$0xff]  }
  0x92   : > { %1963 = vmatprep.subr.bf16.mxu1 %v2413_v27  ;;  %v2442_v27 = vld [vmem:[%s2774_s9 + $0x48] sm:$0xff]  }
  0x93   : > { %v1208_v28 = vshrl.u32 %v2442_v27, 16 }
  0x94   : > { %664 = vmatmul.mubr.bf16.gmra.mrb[12].mxu0 %v2802_v49  ;;  %2140 = vmatmul.mubr.msk.bf16.gmra.mrb[12].mxu1 %vm382_vm1, %v2858_v23 }
  0x95   : > { %1964 = vmatpush3.bf16.msra.mxu1 %v2415_v32  ;;  %670 = vmatprep.mubr.bf16.mxu0 %v2867_v35 }
  0x96   : > { %1965 = vmatprep.subr.bf16.mxu1 %v2417_v34  ;;  %1044 = vmatprep.mubr.bf16.mxu1 %v2807_v51  ;;  %v2426_v51 = vld [vmem:[#allocation5 + $0x1f0] sm:$0xff]  }
  0x97   : > { %2042 = vmatpush3.bf16.msra.mxu0 %v2424_v50  ;;  %v2960_v50 = vld [vmem:[%s3040_s2] ss:$0 sm:$0xff] }
  0x98   : > { %2043 = vmatprep.subr.bf16.mxu0 %v2426_v51 }
  0x99   : > { %1966 = vmatpush3.bf16.msra.mxu1 %v2418_v37 }
  0x9a   : > { %2143 = vmatprep.subr.bf16.mxu1 %v2419_v40 }
  0x9b   : > { %2044 = vmatpush3.bf16.msra.mxu0 %v2427_v56 }
  0x9c   : > { %671 = vmatmul.mubr.bf16.gmra.mrb[16].mxu0 %v2810_v52  ;;  %1045 = vmatmul.mubr.bf16.vlgmr.msra.gmra.mrb[16].mxu1 %v2786_v24  ;;  %v368_v24 = vshrl.u32 %v2852_v21, 16 }
  0x9d   : > { %2144 = vmatpush3.bf16.msra.mxu1 %v2419_v40  ;;  %677 = vmatprep.mubr.bf16.mxu0 %v2877_v46 }
  0x9e   : > { %1051 = vmatprep.mubr.bf16.mxu1 %v2826_v4  ;;  %2145 = vmatprep.subr.bf16.mxu1 %v2422_v47  ;;  %v370_v0 = vor.u32 %v368_v24, %v366_v54 }
  0x9f   : > { %2045 = vmatprep.subr.bf16.mxu0 %v2429_v60 }
  0xa0   : > { %2046 = vmatpush3.bf16.msra.mxu0 %v2430_v61  ;;  %v381_v3 = vsel %vm2895_vm3, %v370_v0, 0 }
  0xa1   : > { %2146 = vmatpush3.bf16.msra.mxu1 %v2422_v47  ;;  %2175 = vmatprep.subr.bf16.mxu0 %v2890_v63 }
  0xa2   : > { %2147 = vmatprep.subr.bf16.mxu1 %v2425_v55 }
  0xa4   : > { %678 = vmatmul.mubr.bf16.gmra.mrb[20].mxu0 %v2829_v5  ;;  %1052 = vmatmul.mubr.bf16.gmra.mrb[20].mxu1 %v2789_v26 }
  0xa5   : > { %684 = vmatprep.mubr.bf16.mxu0 %v2885_v59  ;;  %1058 = vmatprep.mubr.bf16.mxu1 %v2848_v19 }
  0xa6   : > { %2148 = vmatpush3.bf16.msra.mxu1 %v2425_v55 }
  0xa7   : > { %2149 = vmatprep.subr.bf16.mxu1 %v2428_v58 }
  0xaa   : > { %2150 = vmatpush3.bf16.msra.mxu1 %v2428_v58 }
  0xab   : > { %2151 = vmatprep.subr.bf16.mxu1 %v2431_v2 }
  0xac   : > { %685 = vmatmul.mubr.bf16.gmra.mrb[24].mxu0 %v2834_v6  ;;  %1059 = vmatmul.mubr.bf16.gmra.mrb[24].mxu1 %v2802_v49 }
  0xad   : > { %691 = vmatprep.mubr.bf16.mxu0 %v381_v3  ;;  %1065 = vmatprep.mubr.bf16.mxu1 %v2867_v35 }
  0xae   : > { %2152 = vmatpush3.bf16.msra.mxu1 %v2431_v2 }
  0xaf   : > { %2153 = vmatprep.subr.bf16.mxu1 %v2433_v7 }
  0xb2   : > { %2154 = vmatpush3.bf16.msra.mxu1 %v2433_v7 }
  0xb3   : > { %2155 = vmatprep.subr.bf16.mxu1 %v2436_v8 }
  0xb4   : > { %692 = vmatmul.mubr.bf16.gmra.mrb[28].mxu0 %v2852_v21  ;;  %1066 = vmatmul.mubr.bf16.gmra.mrb[28].mxu1 %v2810_v52 }
  0xb5   : > { %1072 = vmatprep.mubr.bf16.mxu1 %v2877_v46  ;;  %1446 = vmatprep.mubr.bf16.mxu0 %v2826_v4  ;;  %v804_v4 = vrot.slane %v802_v12, 1 }
  0xb6   : > { %2156 = vmatpush3.bf16.msra.mxu1 %v2436_v8 }
  0xb7   : > { %2157 = vmatprep.subr.bf16.mxu1 %v2438_v9  ;;  %v805_v16 = vsel %vm307_vm0, %v370_v0, %v804_v4 }
  0xba   : > { %2158 = vmatpush3.bf16.msra.mxu1 %v2438_v9 }
  0xbb   : > { %2207 = vmatprep.subr.bf16.mxu1 %v2890_v63 }
  0xbc   : > { %1073 = vmatmul.mubr.bf16.gmra.mrb[32].mxu1 %v2829_v5  ;;  %1447 = vmatmul.mubr.bf16.vlgmr.msra.gmra.mrb[32].mxu0 %v2789_v26  ;;  %v808_v26 = vor.u32 %v806_v17, %v804_v4 }
  0xbd   : > { %2176 = vmatpush3.bf16.msra.mxu0 %v2890_v63  ;;  %1079 = vmatprep.mubr.bf16.mxu1 %v2885_v59 }
  0xbe   : > { %1453 = vmatprep.mubr.bf16.mxu0 %v2848_v19  ;;  %2177 = vmatprep.subr.bf16.mxu0 %v2434_v11  ;;  %v2440_v19 = vld [vmem:[#allocation5 + $0x220] sm:$0xff]   ;;  %v811_v20 = vsel %vm2895_vm3, %v808_v26, 0 }
  0xc1   : > { %2178 = vmatpush3.bf16.msra.mxu0 %v2434_v11 }
  0xc2   : > { %2179 = vmatprep.subr.bf16.mxu0 %v2437_v14 }
  0xc4   : > { %1080 = vmatmul.mubr.bf16.gmra.mrb[36].mxu1 %v2834_v6  ;;  %1454 = vmatmul.mubr.bf16.gmra.mrb[36].mxu0 %v2802_v49  ;;  %v2443_v49 = vld [vmem:[#allocation5 + $0x230] sm:$0xff]  }
  0xc5   : > { %1086 = vmatprep.mubr.bf16.mxu1 %v805_v16  ;;  %1460 = vmatprep.mubr.bf16.mxu0 %v2867_v35 }
  0xc6   : > { %2180 = vmatpush3.bf16.msra.mxu0 %v2437_v14 }
  0xc7   : > { %2181 = vmatprep.subr.bf16.mxu0 %v2439_v18 }
  0xca   : > { %2182 = vmatpush3.bf16.msra.mxu0 %v2439_v18 }
  0xcb   : > { %2183 = vmatprep.subr.bf16.mxu0 %v2440_v19 }
  0xcc   : > { %1087 = vmatmul.mubr.bf16.gmra.mrb[40].mxu1 %v2852_v21  ;;  %1461 = vmatmul.mubr.bf16.gmra.mrb[40].mxu0 %v2810_v52  ;;  %v1204_v52 = vshll.u32 %v2442_v27, 16 }
  0xcd   : > { %1093 = vmatprep.mubr.bf16.mxu1 %v811_v20  ;;  %1467 = vmatprep.mubr.bf16.mxu0 %v2877_v46 }
  0xce   : > { %2184 = vmatpush3.bf16.msra.mxu0 %v2440_v19 }
  0xcf   : > { %2185 = vmatprep.subr.bf16.mxu0 %v2441_v22 }
  0xd2   : > { %2186 = vmatpush3.bf16.msra.mxu0 %v2441_v22 }
  0xd3   : > { %2187 = vmatprep.subr.bf16.mxu0 %v2443_v49 }
  0xd4   : > { %1094 = vmatmul.mubr.bf16.gmra.mrb[44].mxu1 %v2910_v10  ;;  %1468 = vmatmul.mubr.bf16.gmra.mrb[44].mxu0 %v2829_v5  ;;  %v1206_v5 = vrot.slane %v1204_v52, 1 }
  0xd5   : > { %2159 = vmatprep.mubr.bf16.mxu1 %v2798_v42  ;;  %1474 = vmatprep.mubr.bf16.mxu0 %v2885_v59 }
  0xd6   : > { %2188 = vmatpush3.bf16.msra.mxu0 %v2443_v49  ;;  %v1207_v42 = vsel %vm307_vm0, %v808_v26, %v1206_v5  ;;  %v1210_v29 = vor.u32 %v1208_v28, %v1206_v5 }
  0xd7   : > { %2189 = vmatprep.subr.bf16.mxu0 %v2444_v25 }
  0xd8   : > { %v1213_v32 = vsel %vm2895_vm3, %v1210_v29, 0 }
  0xda   : > { %2190 = vmatpush3.bf16.msra.mxu0 %v2444_v25 }
  0xdc   : > { %2160 = vmatmul.mubr.bf16.vlgmr.msra.gmra.mrb[0].mxu1 %v2816_v57  ;;  %1475 = vmatmul.mubr.bf16.gmra.mrb[48].mxu0 %v2834_v6  ;;  %v812_v6 = vrot.slane %v2910_v10, 1 }
  0xdd   : > { %2215 = vmatpush3.bf16.msra.mxu1 %v2890_v63  ;;  %2163 = vmatprep.mubr.bf16.mxu1 %v2821_v62 }
  0xde   : > { %2208 = vmatprep.subr.bf16.mxu1 %v2434_v11  ;;  %1481 = vmatprep.mubr.bf16.mxu0 %v805_v16  ;;  %v813_v31 = vsel %vm382_vm1, %v2858_v23, %v812_v6 }
  0xe1   : > { %2216 = vmatpush3.bf16.msra.mxu1 %v2434_v11 }
  0xe2   : > { %2209 = vmatprep.subr.bf16.mxu1 %v2437_v14 }
  0xe4   : > { %2164 = vmatmul.mubr.bf16.gmra.mrb[4].mxu1 %v2840_v13  ;;  %1482 = vmatmul.mubr.bf16.gmra.mrb[52].mxu0 %v2852_v21  ;;  %v1214_v21 = vrot.slane %v2442_v27, 1 }
  0xe5   : > { %2217 = vmatpush3.bf16.msra.mxu1 %v2437_v14  ;;  %2167 = vmatprep.mubr.bf16.mxu1 %v2844_v15 }
  0xe6   : > { %2210 = vmatprep.subr.bf16.mxu1 %v2439_v18  ;;  %1488 = vmatprep.mubr.bf16.mxu0 %v1207_v42  ;;  %v1215_v23 = vsel %vm382_vm1, %v812_v6, %v1214_v21 }
  0xe9   : > { %2218 = vmatpush3.bf16.msra.mxu1 %v2439_v18 }
  0xea   : > { %2211 = vmatprep.subr.bf16.mxu1 %v2440_v19 }
  0xec   : > { %2168 = vmatmul.mubr.bf16.gmra.mrb[8].mxu1 %v2862_v30  ;;  %1489 = vmatmul.mubr.bf16.gmra.mrb[56].mxu0 %v2910_v10 }
  0xed   : > { %2219 = vmatpush3.bf16.msra.mxu1 %v2440_v19  ;;  %2171 = vmatprep.mubr.bf16.mxu1 %v813_v31 }
  0xee   : > { %2212 = vmatprep.subr.bf16.mxu1 %v2441_v22  ;;  %1495 = vmatprep.mubr.bf16.mxu0 %v1213_v32 }
  0xf1   : > { %2220 = vmatpush3.bf16.msra.mxu1 %v2441_v22 }
  0xf2   : > { %2213 = vmatprep.subr.bf16.mxu1 %v2443_v49 }
  0xf4   : > { %2172 = vmatmul.mubr.msk.bf16.gmra.mrb[12].mxu1 %vm382_vm1, %v812_v6  ;;  %1496 = vmatmul.mubr.bf16.gmra.mrb[60].mxu0 %v2442_v27 }
  0xf5   : > { %2221 = vmatpush3.bf16.msra.mxu1 %v2443_v49  ;;  %2191 = vmatprep.mubr.bf16.mxu0 %v2816_v57 }
  0xf6   : > { %2214 = vmatprep.subr.bf16.mxu1 %v2444_v25  ;;  %2199 = vmatprep.mubr.bf16.mxu1 %v2862_v30 }
  0xf9   : > { %2222 = vmatpush3.bf16.msra.mxu1 %v2444_v25 }
  0xfc   : > { %2192 = vmatmul.mubr.bf16.vlgmr.msra.gmra.mrb[64].mxu0 %v2821_v62  ;;  %2200 = vmatmul.mubr.bf16.vlgmr.msra.gmra.mrb[8].mxu1 %v813_v31 }
  0xfd   : > { %2195 = vmatprep.mubr.bf16.mxu0 %v2840_v13  ;;  %2203 = vmatprep.mubr.bf16.mxu1 %v1215_v23 }
 0x104   : > { %2196 = vmatmul.mubr.bf16.gmra.mrb[68].mxu0 %v2844_v15  ;;  %2204 = vmatmul.mubr.msk.bf16.gmra.mrb[12].mxu1 %vm382_vm1, %v1214_v21 }
 0x14f   : > { %v1887_v33 = vpop.f32.mrb[0].mxu0 }
 0x150   : > { %v1888_v34 = vpop.f32.mrb[1].mxu0 }
 0x151   : > { %v1889_v57 = vadd.f32 %v1888_v34, %v1887_v33  ;;  %v1890_v35 = vpop.f32.mrb[2].mxu0 }
 0x152   : > { %v1891_v36 = vpop.f32.mrb[3].mxu0 }
 0x153   : > { %v2228_v56 = vadd.f32 %v1889_v57, %v2960_v50 }
 0x157   : > { %v1893_v30 = vpop.f32.mrb[4].mxu0 }
 0x158   : > { %v1894_v37 = vpop.f32.mrb[5].mxu0 }
 0x159   : > { %v1895_v38 = vadd.f32 %v1894_v37, %v1893_v30  ;;  %v1896_v39 = vpop.f32.mrb[6].mxu0 }
 0x15a   : > { %v1897_v40 = vpop.f32.mrb[7].mxu0 }
 0x15b   : > { %v2223_v8 = vadd.f32 %v1895_v38, %v2960_v50 }
 0x15f   : > { %v1899_v41 = vpop.f32.mrb[8].mxu0 }
 0x160   : > { %v1900_v62 = vpop.f32.mrb[9].mxu0 }
 0x161   : > { %v1901_v43 = vadd.f32 %v1900_v62, %v1899_v41  ;;  %v1902_v44 = vpop.f32.mrb[10].mxu0 }
 0x162   : > { %v1903_v13 = vpop.f32.mrb[11].mxu0 }
 0x163   : > { %v2238_v20 = vadd.f32 %v1901_v43, %v2960_v50 }
 0x167   : > { %v1905_v45 = vpop.f32.mrb[12].mxu0 }
 0x168   : > { %v1906_v46 = vpop.f32.mrb[13].mxu0 }
 0x169   : > { %v1907_v15 = vadd.f32 %v1906_v46, %v1905_v45  ;;  %v1908_v47 = vpop.f32.mrb[14].mxu0 }
 0x16a   : > { %v1909_v48 = vpop.f32.mrb[15].mxu0 }
 0x16b   : > { %v2233_v32 = vadd.f32 %v1907_v15, %v2960_v50 }
 0x16f   : > { %v1911_v51 = vpop.f32.mrb[16].mxu0  ;;  %v1967_v53 = vpop.f32.mrb[16].mxu1 }
 0x170   : > { %v1912_v54 = vpop.f32.mrb[17].mxu0  ;;  %v1968_v55 = vpop.f32.mrb[17].mxu1 }
 0x171   : > { %v1913_v58 = vadd.f32 %v1912_v54, %v1911_v51  ;;  %v1969_v59 = vadd.f32 %v1968_v55, %v1967_v53  ;;  %v1914_v24 = vpop.f32.mrb[18].mxu0  ;;  %v1970_v60 = vpop.f32.mrb[18].mxu1 }
 0x172   : > { %v1915_v61 = vpop.f32.mrb[19].mxu0  ;;  %v1971_v63 = vpop.f32.mrb[19].mxu1 }
 0x173   : > { %v2963_v0 = vadd.f32 %v2228_v56, %v1969_v59  ;;  %v2247_v40 = vadd.f32 %v1913_v58, %v2960_v50 }
 0x177   : > { %v1917_v1 = vpop.f32.mrb[20].mxu0  ;;  %v1973_v2 = vpop.f32.mrb[20].mxu1 }
 0x178   : > { %v1918_v3 = vpop.f32.mrb[21].mxu0  ;;  %v1974_v7 = vpop.f32.mrb[21].mxu1 }
 0x179   : > { %v1919_v9 = vadd.f32 %v1918_v3, %v1917_v1  ;;  %v1975_v10 = vadd.f32 %v1974_v7, %v1973_v2  ;;  %v1920_v11 = vpop.f32.mrb[22].mxu0  ;;  %v1976_v12 = vpop.f32.mrb[22].mxu1 }
 0x17a   : > { %v1921_v4 = vpop.f32.mrb[23].mxu0  ;;  %v1977_v14 = vpop.f32.mrb[23].mxu1 }
 0x17b   : > { %v2966_v16 = vadd.f32 %v2223_v8, %v1975_v10  ;;  %v2243_v53 = vadd.f32 %v1919_v9, %v2960_v50 }
 0x17f   : > { %v1923_v17 = vpop.f32.mrb[24].mxu0  ;;  %v1979_v18 = vpop.f32.mrb[24].mxu1 }
 0x180   : > { %v1924_v26 = vpop.f32.mrb[25].mxu0  ;;  %v1980_v19 = vpop.f32.mrb[25].mxu1 }
 0x181   : > { %v1925_v22 = vadd.f32 %v1924_v26, %v1923_v17  ;;  %v1981_v49 = vadd.f32 %v1980_v19, %v1979_v18  ;;  %v1926_v25 = vpop.f32.mrb[26].mxu0  ;;  %v1982_v27 = vpop.f32.mrb[26].mxu1 }
 0x182   : > { %v1927_v52 = vpop.f32.mrb[27].mxu0  ;;  %v1983_v5 = vpop.f32.mrb[27].mxu1 }
 0x183   : > { %v2969_v42 = vadd.f32 %v2238_v20, %v1981_v49  ;;  %v2255_v3 = vadd.f32 %v1925_v22, %v2960_v50 }
 0x187   : > { %v1929_v28 = vpop.f32.mrb[28].mxu0  ;;  %v1985_v6 = vpop.f32.mrb[28].mxu1 }
 0x188   : > { %v1930_v29 = vpop.f32.mrb[29].mxu0  ;;  %v1986_v31 = vpop.f32.mrb[29].mxu1 }
 0x189   : > { %v1931_v21 = vadd.f32 %v1930_v29, %v1929_v28  ;;  %v1987_v23 = vadd.f32 %v1986_v31, %v1985_v6  ;;  %v1932_v33 = vpop.f32.mrb[30].mxu0  ;;  %v1988_v34 = vpop.f32.mrb[30].mxu1 }
 0x18a   : > { %v1933_v57 = vpop.f32.mrb[31].mxu0  ;;  %v1989_v35 = vpop.f32.mrb[31].mxu1 }
 0x18b   : > { %v2972_v36 = vadd.f32 %v2233_v32, %v1987_v23  ;;  %v2251_v19 = vadd.f32 %v1931_v21, %v2960_v50 }
 0x18f   : > { %v1991_v30 = vpop.f32.mrb[32].mxu1  ;;  %v2047_v37 = vpop.f32.mrb[32].mxu0 }
 0x190   : > { %v1992_v38 = vpop.f32.mrb[33].mxu1  ;;  %v2048_v39 = vpop.f32.mrb[33].mxu0 }
 0x191   : > { %v1993_v41 = vadd.f32 %v1992_v38, %v1991_v30  ;;  %v2049_v62 = vadd.f32 %v2048_v39, %v2047_v37  ;;  %v1994_v43 = vpop.f32.mrb[34].mxu1  ;;  %v2050_v44 = vpop.f32.mrb[34].mxu0 }
 0x192   : > { %v1995_v13 = vpop.f32.mrb[35].mxu1  ;;  %v2051_v45 = vpop.f32.mrb[35].mxu0 }
 0x193   : > { %v2248_v46 = vadd.f32 %v2247_v40, %v1993_v41 }
 0x197   : > { %v1997_v15 = vpop.f32.mrb[36].mxu1  ;;  %v2053_v47 = vpop.f32.mrb[36].mxu0 }
 0x198   : > { %v1998_v48 = vpop.f32.mrb[37].mxu1  ;;  %v2054_v51 = vpop.f32.mrb[37].mxu0 }
 0x199   : > { %v1999_v54 = vadd.f32 %v1998_v48, %v1997_v15  ;;  %v2055_v55 = vadd.f32 %v2054_v51, %v2053_v47  ;;  %v2000_v56 = vpop.f32.mrb[38].mxu1  ;;  %v2056_v59 = vpop.f32.mrb[38].mxu0 }
 0x19a   : > { %v2001_v24 = vpop.f32.mrb[39].mxu1  ;;  %v2057_v60 = vpop.f32.mrb[39].mxu0 }
 0x19b   : > { %v2244_v58 = vadd.f32 %v2243_v53, %v1999_v54 }
 0x19f   : > { %v2003_v61 = vpop.f32.mrb[40].mxu1  ;;  %v2059_v63 = vpop.f32.mrb[40].mxu0 }
 0x1a0   : > { %v2004_v1 = vpop.f32.mrb[41].mxu1  ;;  %v2060_v2 = vpop.f32.mrb[41].mxu0 }
 0x1a1   : > { %v2005_v7 = vadd.f32 %v2004_v1, %v2003_v61  ;;  %v2061_v8 = vadd.f32 %v2060_v2, %v2059_v63  ;;  %v2006_v10 = vpop.f32.mrb[42].mxu1  ;;  %v2062_v11 = vpop.f32.mrb[42].mxu0 }
 0x1a2   : > { %v2007_v12 = vpop.f32.mrb[43].mxu1  ;;  %v2063_v4 = vpop.f32.mrb[43].mxu0 }
 0x1a3   : > { %v2256_v9 = vadd.f32 %v2255_v3, %v2005_v7 }
 0x1a7   : > { %v2009_v14 = vpop.f32.mrb[44].mxu1  ;;  %v2065_v17 = vpop.f32.mrb[44].mxu0 }
 0x1a8   : > { %v2010_v18 = vpop.f32.mrb[45].mxu1  ;;  %v2066_v26 = vpop.f32.mrb[45].mxu0 }
 0x1a9   : > { %v2011_v20 = vadd.f32 %v2010_v18, %v2009_v14  ;;  %v2067_v49 = vadd.f32 %v2066_v26, %v2065_v17  ;;  %v2012_v25 = vpop.f32.mrb[46].mxu1  ;;  %v2068_v27 = vpop.f32.mrb[46].mxu0 }
 0x1aa   : > { %v2013_v52 = vpop.f32.mrb[47].mxu1  ;;  %v2069_v5 = vpop.f32.mrb[47].mxu0 }
 0x1ab   : > { %v2252_v22 = vadd.f32 %v2251_v19, %v2011_v20 }
 0x1af   : > { %v2161_v28 = vpop.f32.mrb[0].mxu1  ;;  %v2071_v6 = vpop.f32.mrb[48].mxu0 }
 0x1b0   : > { %v2225_v29 = vadd.f32 %v2966_v16, %v2161_v28  ;;  %v1135_v31 = vpop.f32.mrb[1].mxu1  ;;  %v2072_v32 = vpop.f32.mrb[49].mxu0 }
 0x1b1   : > { %v2230_v23 = vadd.f32 %v2963_v0, %v1135_v31  ;;  %v2073_v33 = vadd.f32 %v2072_v32, %v2071_v6  ;;  %v2162_v34 = vpop.f32.mrb[2].mxu1  ;;  %v2074_v57 = vpop.f32.mrb[50].mxu0 }
 0x1b2   : > { %v1138_v35 = vpop.f32.mrb[3].mxu1  ;;  %v2075_v50 = vpop.f32.mrb[51].mxu0  ;;  %v2226_v21 = vadd.f32 %v2225_v29, %v2055_v55 }
 0x1b3   : > { %v2231_v30 = vadd.f32 %v2230_v23, %v2049_v62  ;;  %v2249_v37 = vadd.f32 %v2248_v46, %v2073_v33 }
 0x1b7   : > { %v2165_v38 = vpop.f32.mrb[4].mxu1  ;;  %v2077_v39 = vpop.f32.mrb[52].mxu0 }
 0x1b8   : > { %v2235_v40 = vadd.f32 %v2972_v36, %v2165_v38  ;;  %v1149_v41 = vpop.f32.mrb[5].mxu1  ;;  %v2078_v43 = vpop.f32.mrb[53].mxu0 }
 0x1b9   : > { %v2240_v16 = vadd.f32 %v2969_v42, %v1149_v41  ;;  %v2079_v44 = vadd.f32 %v2078_v43, %v2077_v39  ;;  %v2166_v13 = vpop.f32.mrb[6].mxu1  ;;  %v2080_v45 = vpop.f32.mrb[54].mxu0 }
 0x1ba   : > { %v1152_v0 = vpop.f32.mrb[7].mxu1  ;;  %v2081_v15 = vpop.f32.mrb[55].mxu0  ;;  %v2236_v47 = vadd.f32 %v2235_v40, %v2067_v49 }
 0x1bb   : > { %v2245_v48 = vadd.f32 %v2244_v58, %v2079_v44  ;;  %v2241_v51 = vadd.f32 %v2240_v16, %v2061_v8 }
 0x1bf   : > { %v2083_v53 = vpop.f32.mrb[56].mxu0 }
 0x1c0   : > { %v2084_v54 = vpop.f32.mrb[57].mxu0 }
 0x1c1   : > { %v2085_v62 = vadd.f32 %v2084_v54, %v2083_v53  ;;  %v2086_v46 = vpop.f32.mrb[58].mxu0 }
 0x1c2   : > { %v2087_v55 = vpop.f32.mrb[59].mxu0 }
 0x1c3   : > { %v2257_v56 = vadd.f32 %v2256_v9, %v2085_v62 }
 0x1c7   : > { %v2089_v36 = vpop.f32.mrb[60].mxu0 }
 0x1c8   : > { %v2090_v59 = vpop.f32.mrb[61].mxu0 }
 0x1c9   : > { %v2091_v24 = vadd.f32 %v2090_v59, %v2089_v36  ;;  %v2092_v60 = vpop.f32.mrb[62].mxu0 }
 0x1ca   : > { %v2093_v42 = vpop.f32.mrb[63].mxu0 }
 0x1cb   : > { %v2253_v61 = vadd.f32 %v2252_v22, %v2091_v24 }
 0x1cf   : > { %v2193_v63 = vpop.f32.mrb[64].mxu0  ;;  %v2201_v1 = vpop.f32.mrb[8].mxu1 }
 0x1d0   : > { %v2227_v2 = vadd.f32 %v2226_v21, %v2193_v63  ;;  %v2246_v3 = vadd.f32 %v2245_v48, %v2201_v1  ;;  %v1537_v7 = vpop.f32.mrb[65].mxu0  ;;  %v1565_v58 = vpop.f32.mrb[9].mxu1 }
 0x1d1   : > { %v2232_v8 = vadd.f32 %v2231_v30, %v1537_v7  ;;  %v2250_v10 = vadd.f32 %v2249_v37, %v1565_v58  ;;  %v2194_v11 = vpop.f32.mrb[66].mxu0  ;;  %v2202_v12 = vpop.f32.mrb[10].mxu1 }
 0x1d2   : > { %v1601_v4 = vmax.f32 %v2227_v2, 0.0  ;;  %v1605_v14 = vmax.f32 %v2246_v3, 0.0  ;;  %v1540_v9 = vpop.f32.mrb[67].mxu0  ;;  %v1568_v17 = vpop.f32.mrb[11].mxu1 }
 0x1d3   : > { %v1600_v18 = vmax.f32 %v2232_v8, 0.0  ;;  %v1604_v26 = vmax.f32 %v2250_v10, 0.0 }
 0x1d5   : > { %v1851_v19 = vpack.c.bf16 %v1601_v4, %v1600_v18  ;;  %v1861_v20 = vpack.c.bf16 %v1605_v14, %v1604_v26 }
 0x1d7   : > { %1852 = vst [vmem:[%s235_s10] sm:$0xff] %v1851_v19   ;;  %1869 = vst [vmem:[%s235_s10 + $0x10] sm:$0xff] %v1861_v20   ;;  %v2197_v49 = vpop.f32.mrb[68].mxu0  ;;  %v2205_v25 = vpop.f32.mrb[12].mxu1 }
 0x1d8   : > { %v2237_v27 = vadd.f32 %v2236_v47, %v2197_v49  ;;  %v2254_v52 = vadd.f32 %v2253_v61, %v2205_v25  ;;  %v1551_v5 = vpop.f32.mrb[69].mxu0  ;;  %v1579_v22 = vpop.f32.mrb[13].mxu1 }
 0x1d9   : > { %v2242_v28 = vadd.f32 %v2241_v51, %v1551_v5  ;;  %v2258_v6 = vadd.f32 %v2257_v56, %v1579_v22  ;;  %v2198_v29 = vpop.f32.mrb[70].mxu0  ;;  %v2206_v31 = vpop.f32.mrb[14].mxu1 }
 0x1da   : > { %v1603_v32 = vmax.f32 %v2237_v27, 0.0  ;;  %v1607_v23 = vmax.f32 %v2254_v52, 0.0  ;;  %v1554_v33 = vpop.f32.mrb[71].mxu0  ;;  %v1582_v34 = vpop.f32.mrb[15].mxu1 }
 0x1db   : > { %v1602_v57 = vmax.f32 %v2242_v28, 0.0  ;;  %v1606_v35 = vmax.f32 %v2258_v6, 0.0 }
 0x1dd   : > { %v1856_v50 = vpack.c.bf16 %v1603_v32, %v1602_v57  ;;  %v1866_v21 = vpack.c.bf16 %v1607_v23, %v1606_v35 }
 0x1df   : > { %1868 = vst [vmem:[%s235_s10 + $0x8] sm:$0xff] %v1856_v50   ;;  %1870 = vst [vmem:[%s235_s10 + $0x18] sm:$0xff] %v1866_v21  }
 0x1e0   : > { %2516 = shalt.err (!%p2513_p5)
}
 0x1e1   : > { %s2517_s26 = scalar_lea.hbm %s2989_s19, 512  ;;  %s2521_s20 = scalar_lea.hbm %s3041_s3, 1024 }
 0x1e2   : > { %p2518_p9 = scmp.ne.s32.totalorder %s2989_s19, %s2517_s26  ;;  %p2522_p3 = scmp.lt.u32.totalorder %s2989_s19, %s3041_s3 }
 0x1e3   : > { %p2523_p7 = scmp.lt.u32.totalorder %s2521_s20, %s2517_s26  ;;  %p2525_p4 = scmp.lt.u32.totalorder %s2517_s26, %s2989_s19 }
 0x1e4   : > { %p2519_p1 = pnand %p2518_p9, %p2713_p10 }
 0x1e5   : > { %p2524_p11 = por %p2523_p7, %p2522_p3 }
 0x1e6   : > { %p2520_p2 = pneg %p2519_p1 }
 0x1e7   : > { %p2526_p6 = por %p2525_p4, %p2524_p11 }
 0x1e9   : > { %p2527_p8 = pnand %p2526_p6, %p2520_p2 }
 0x1eb   : > { %2530 = shalt.err (!%p2527_p8)
}
 0x1ec   : > { %s2596_s10 = smov 64   ;;  %s2597_s7 = smov 4  }
 0x1ed   : > { %2292 = dma.vmem_to_hbm [thread:$0]  (%p2713_p10), %s2984_s11, 512, %s2989_s19, %s1625_s15, %s2596_s10, %s2596_s10, %s2597_s7  }
 0x1ee PF: > { %s1654_s8 = sand.u32 1, %s2569_s12   ;;  %p3060_p12 = scmp.ne.s32.totalorder %s3049_s23, 0 }
 0x1ef   : > { %p3061_p13 = scmp.ge.s32.totalorder %s2589_s17, 2  ;;  %s1655_s18 = scalar_lea.sflag [#allocation4], %s1654_s8 }
 0x1f1   : > { %p2303_p0 = pnand %p3061_p13, %p3060_p12 }
 0x1f3   : > { %2564 = dma.done.wait (!%p2303_p0), %s1655_s18, 512  }
 0x1f4   : > { %2566 = vsyncadd (!%p2303_p0), %s1655_s18, 4294966784  ;;  %s20_s17 = sadd.s32 1, %s2589_s17   ;;  %s3062_s12 = smov %s2573_s13 }
 0x1f5   : > { %p17_p5 = scmp.ge.s32.totalorder %s20_s17, 4   ;;  %s3063_s13 = smov %s2577_s14 }
 0x1f6   : > { %s3064_s14 = smov %s2722_s5  ;;  %s3065_s15 = smov %s2585_s16 }
 0x1f7   : > { %s3066_s16 = smov %s3068_s28  ;;  %19 = sbr.rel (!%p17_p5) target bundleno = 7 (0x7), region = 87 }
 0x1fe   :  { %1660 = vsyncpa [#allocation3], 1 }
 0x1ff   :  { %1662 = vsyncpa [#allocation3 + $0x1], 1 }
 0x200   :  { %1663 = vsyncpa [#allocation6], 1 }
 0x201   :  { %1664 = vsyncpa [#allocation4], 1 }
 0x202   :  { %1666 = vsyncpa [#allocation4 + $0x1], 1 }

</bundles_post_ra>
